<compile_context>
chip_gen: v6e
topology: v6e:2x2x1
jax: 0.10.0
libtpu: 0.0.40
codegen_flags: <defaults>
</compile_context>

<pallas_src>
import math
from functools import partial

import jax
import jax.numpy as jnp
from jax import lax
from jax.experimental import pallas as pl
from jax.experimental.pallas import tpu as pltpu

_LANE = 128


def _sublane_multiple(dtype):
    # Rows pack along sublanes for sub-32-bit dtypes: f32 -> 8, bf16 -> 16, 8-bit -> 32.
    return max(8, 32 // jnp.dtype(dtype).itemsize)


def _vmem_capacity_bytes():
    """Physical VMEM per TensorCore (128 MiB v5e/v6e, 64 MiB v7x); safe fallback."""
    try:
        info = pltpu.get_tpu_info()
        cap = getattr(info, "vmem_capacity_bytes", None)
        if cap:
            return int(cap)
    except Exception:
        pass
    return 64 * 1024 * 1024  # conservative (v7x-sized) fallback


def _choose_heads_per_block(num_head, head_dim, head_class, compute_itemsize, budget):
    """How many heads to process per grid step.

    Prefers the whole-weight fast path (weights DMAed once, contiguous x rows,
    lane-dense num_classes-wide output stores).  Otherwise picks the smallest
    divisor of num_head whose x / output block last dims are 128-lane aligned
    and whose double-buffered weight block fits the budget.
    """
    w1 = head_class * head_dim * compute_itemsize
    if 2 * num_head * w1 <= budget:
        return num_head
    for hpb in range(1, num_head):
        if num_head % hpb:
            continue
        if (hpb * head_dim) % _LANE or (hpb * head_class) % _LANE:
            continue
        if 2 * hpb * w1 <= budget:
            return hpb
    # Last resort: whole-weight path (no lane-alignment requirement); relies on
    # the raised vmem limit.  See TODO(synk) above for the padding fallback.
    return num_head


def _choose_b_tile(B, hpb, head_dim, head_class, compute_itemsize, out_itemsize,
                   tile_budget, sublane):
    """Largest batch tile (cap 1024, packed-sublane multiple) whose
    double-buffered x (compute dtype) + out (out dtype) footprint fits."""
    per_row = 2 * (hpb * head_dim * compute_itemsize + hpb * head_class * out_itemsize)
    tile = tile_budget // max(per_row, 1)
    tile = max(sublane, min(1024, tile))
    tile = (tile // sublane) * sublane
    if tile >= B:
        return B  # full-batch block (allowed even if B is not sublane-aligned)
    return int(tile)


def _mhc_kernel(x_ref, w_ref, o_ref, *, hpb, head_dim, head_class):
    # x_ref: (b_tile, hpb*head_dim)      -- hpb heads' feature slices, one batch tile
    # w_ref: (hpb, head_class, head_dim) -- those heads' weights (PyTorch layout)
    # o_ref: (b_tile, hpb*head_class)
    outs = []
    for j in range(hpb):  # static unroll; back-to-back MXU matmuls
        xj = x_ref[:, j * head_dim:(j + 1) * head_dim]
        wj = w_ref[j]
        outs.append(
            lax.dot_general(
                xj, wj,
                dimension_numbers=(((1,), (1,)), ((), ())),  # x @ W^T
                preferred_element_type=jnp.float32,
            )
        )
    res = outs[0] if hpb == 1 else jnp.concatenate(outs, axis=1)
    o_ref[...] = res.astype(o_ref.dtype)  # single lane-dense store


def multi_head_classifier_forward(x, weights, *, b_tile=None, heads_per_block=None,
                                  compute_dtype="auto", vmem_limit_bytes=None):
    """Pallas equivalent of MultiHeadClassifier.forward.

    Args:
      x:       [B, feat_dim]                             (batch-major, as PyTorch).
      weights: [num_head, head_class, head_dim]          (PyTorch Linear layout).
      b_tile / heads_per_block: optional tiling overrides.
      compute_dtype: "auto" (bf16 when x is f32), None (keep dtype) or a dtype.
                     Accumulation is always f32; output keeps x's original dtype.
      vmem_limit_bytes: optional scoped-VMEM override (default: ~70% of physical).

    Returns:
      (output, None) with output [B, num_head*head_class] == torch.cat(..., dim=1).
    """
    num_head, head_class, head_dim = weights.shape
    B, feat_dim = x.shape
    assert feat_dim == num_head * head_dim, "feat_dim must equal num_head * head_dim"
    num_classes = num_head * head_class

    out_dtype = x.dtype
    if compute_dtype == "auto":
        compute_dtype = jnp.bfloat16 if x.dtype == jnp.float32 else None
    if compute_dtype is not None:
        x = x.astype(compute_dtype)
        weights = weights.astype(compute_dtype)

    compute_itemsize = jnp.dtype(x.dtype).itemsize
    out_itemsize = jnp.dtype(out_dtype).itemsize

    if vmem_limit_bytes is None:
        cap = _vmem_capacity_bytes()
        vmem_limit_bytes = max(32 * 1024 * 1024, int(cap * 0.7))
    tile_budget = max(vmem_limit_bytes - (4 << 20), 1 << 20)  # ~4 MiB compiler headroom

    if heads_per_block is None:
        hpb = _choose_heads_per_block(num_head, head_dim, head_class,
                                      compute_itemsize, tile_budget)
    else:
        hpb = int(heads_per_block)
        assert num_head % hpb == 0, "heads_per_block must divide num_head"
        if hpb != num_head:
            assert (hpb * head_dim) % _LANE == 0 and (hpb * head_class) % _LANE == 0, (
                "grouped path needs 128-lane-aligned x / output blocks")

    sublane = _sublane_multiple(x.dtype)
    weight_block_bytes = 2 * hpb * head_class * head_dim * compute_itemsize
    if b_tile is None:
        b_tile = _choose_b_tile(B, hpb, head_dim, head_class, compute_itemsize,
                                out_itemsize, max(tile_budget - weight_block_bytes, 0),
                                sublane)

    nb = pl.cdiv(B, b_tile)
    kernel = partial(_mhc_kernel, hpb=hpb, head_dim=head_dim, head_class=head_class)

    cost = pl.CostEstimate(
        flops=2 * B * feat_dim * head_class,
        transcendentals=0,
        bytes_accessed=(x.size * compute_itemsize
                        + weights.size * compute_itemsize
                        + B * num_classes * out_itemsize),
    )

    if hpb == num_head:
        # Fast path: whole weight tensor resident (DMAed once -- constant index
        # map), contiguous full-row x DMAs, num_classes-wide lane-dense stores.
        grid_spec = pltpu.PrefetchScalarGridSpec(
            num_scalar_prefetch=0,
            grid=(nb,),
            in_specs=[
                pl.BlockSpec((b_tile, feat_dim), lambda b: (b, 0)),
                pl.BlockSpec((num_head, head_class, head_dim), lambda b: (0, 0, 0)),
            ],
            out_specs=pl.BlockSpec((b_tile, num_classes), lambda b: (b, 0)),
        )
        dims = ("parallel",)
    else:
        # Grouped path: head-group OUTER, batch tile INNER so each group's
        # weights stay resident in VMEM across all batch tiles.
        ng = num_head // hpb
        grid_spec = pltpu.PrefetchScalarGridSpec(
            num_scalar_prefetch=0,
            grid=(ng, nb),
            in_specs=[
                pl.BlockSpec((b_tile, hpb * head_dim), lambda g, b: (b, g)),
                pl.BlockSpec((hpb, head_class, head_dim), lambda g, b: (g, 0, 0)),
            ],
            out_specs=pl.BlockSpec((b_tile, hpb * head_class), lambda g, b: (b, g)),
        )
        dims = ("parallel", "parallel")

    out = pl.pallas_call(
        kernel,
        out_shape=jax.ShapeDtypeStruct((B, num_classes), out_dtype),
        grid_spec=grid_spec,
        compiler_params=pltpu.CompilerParams(
            dimension_semantics=dims,
            vmem_limit_bytes=int(vmem_limit_bytes),
        ),
        cost_estimate=cost,
    )(x, weights)

    return out, None


def init_weights(key, num_classes, feat_dim, num_head):
    """Deterministic re-implementation of reset_parameters (uniform +/- 1/sqrt(fan_in))."""
    head_dim = feat_dim // num_head
    head_class = num_classes // num_head
    stdv = 1.0 / math.sqrt(head_dim)
    keys = jax.random.split(key, num_head)
    ws = [
        jax.random.uniform(k, (head_class, head_dim), minval=-stdv, maxval=stdv,
                           dtype=jnp.float32)
        for k in keys
    ]
    return jnp.stack(ws, axis=0)  # [num_head, head_class, head_dim]


if __name__ == "__main__":
    # Small shapes consistent with the module (feat_dim / num_classes divisible
    # by num_head); head_dim = head_class = 128 keeps every block lane-dense.
    batch = 16
    feat_dim = 256
    num_classes = 256
    num_head = 2

    key = jax.random.PRNGKey(0)
    kx, kw = jax.random.split(key)

    x = jax.random.normal(kx, (batch, feat_dim), dtype=jnp.float32)
    weights = init_weights(kw, num_classes, feat_dim, num_head)

    # Reference in plain JAX (same math as the PyTorch forward).
    head_dim = feat_dim // num_head
    ref = jnp.concatenate(
        [x[:, h * head_dim:(h + 1) * head_dim] @ weights[h].T for h in range(num_head)],
        axis=1,
    )

    # 1) Default path: bf16 compute (f32 accumulation), fast whole-weight path.
    out, aux = multi_head_classifier_forward(x, weights)
    out = jax.block_until_ready(out)
    assert out.shape == (batch, num_classes)
    assert aux is None
    assert out.dtype == x.dtype
    assert jnp.allclose(out, ref, atol=2e-2, rtol=2e-2), float(jnp.max(jnp.abs(out - ref)))

    # 2) f32 compute, forced grouped (per-head) path -> exercises the fallback
    #    tiling with tight numerical tolerance.
    out32, _ = multi_head_classifier_forward(x, weights, compute_dtype=None,
                                             heads_per_block=1)
    out32 = jax.block_until_ready(out32)
    assert jnp.allclose(out32, ref, atol=1e-4, rtol=1e-4), float(
        jnp.max(jnp.abs(out32 - ref)))

    print("KERNEL_OK")
</pallas_src>

<mosaic_0001>
module attributes {stable_mosaic.version = 11 : i64} {
  func.func @_mhc_kernel(%arg0: i32, %arg1: memref<16x256xbf16, #tpu.memory_space<vmem>>, %arg2: memref<2x128x128xbf16, #tpu.memory_space<vmem>>, %arg3: memref<16x256xf32, #tpu.memory_space<vmem>>) attributes {dimension_semantics = [#tpu.dimension_semantics<parallel>], iteration_bounds = array<i64: 1>, scalar_prefetch = 0 : i64, scratch_operands = 0 : i64, tpu.core_type = #tpu.core_type<tc>, window_params = [{transform_indices = @transform_0, window_bounds = array<i64: 16, 256>}, {pipeline_mode = #tpu.pipeline_mode<synchronous>, transform_indices = @transform_1, window_bounds = array<i64: 2, 128, 128>}, {transform_indices = @transform_2, window_bounds = array<i64: 16, 256>}]} {
    %c0 = arith.constant 0 : index
    %c0_0 = arith.constant 0 : index
    %0 = vector.load %arg1[%c0, %c0_0] : memref<16x256xbf16, #tpu.memory_space<vmem>>, vector<16x128xbf16>
    %c0_1 = arith.constant 0 : index
    %c0_2 = arith.constant 0 : index
    %c0_3 = arith.constant 0 : index
    %1 = vector.load %arg2[%c0_1, %c0_2, %c0_3] : memref<2x128x128xbf16, #tpu.memory_space<vmem>>, vector<1x128x128xbf16>
    %2 = vector.shape_cast %1 : vector<1x128x128xbf16> to vector<128x128xbf16>
    %cst = arith.constant dense<0.000000e+00> : vector<16x128xf32>
    %3 = tpu.matmul %0, %2, %cst {dimension_numbers = #tpu.dot_dimension_numbers<[1], [1], [0], [0], [0, 0, 1, 0], [], []>} : vector<16x128xbf16>, vector<128x128xbf16>, vector<16x128xf32> -> vector<16x128xf32>
    %c0_4 = arith.constant 0 : index
    %c128 = arith.constant 128 : index
    %4 = vector.load %arg1[%c0_4, %c128] : memref<16x256xbf16, #tpu.memory_space<vmem>>, vector<16x128xbf16>
    %c1 = arith.constant 1 : index
    %c0_5 = arith.constant 0 : index
    %c0_6 = arith.constant 0 : index
    %5 = vector.load %arg2[%c1, %c0_5, %c0_6] : memref<2x128x128xbf16, #tpu.memory_space<vmem>>, vector<1x128x128xbf16>
    %6 = vector.shape_cast %5 : vector<1x128x128xbf16> to vector<128x128xbf16>
    %cst_7 = arith.constant dense<0.000000e+00> : vector<16x128xf32>
    %7 = tpu.matmul %4, %6, %cst_7 {dimension_numbers = #tpu.dot_dimension_numbers<[1], [1], [0], [0], [0, 0, 1, 0], [], []>} : vector<16x128xbf16>, vector<128x128xbf16>, vector<16x128xf32> -> vector<16x128xf32>
    %8 = tpu.concatenate %3, %7 in 1 : vector<16x128xf32>, vector<16x128xf32> -> vector<16x256xf32>
    %c0_8 = arith.constant 0 : index
    %c0_9 = arith.constant 0 : index
    %9 = vector.load %arg3[%c0_8, %c0_9] : memref<16x256xf32, #tpu.memory_space<vmem>>, vector<16x256xf32>
    tpu.vector_store %arg3[%c0_8, %c0_9], %8 {strides = array<i32>} : memref<16x256xf32, #tpu.memory_space<vmem>>, vector<16x256xf32>,
    return
  }
  func.func @transform_0(%arg0: i32) -> (i32, i32) {
    %c0_i32 = arith.constant 0 : i32
    %c0_i32_0 = arith.constant 0 : i32
    return %arg0, %c0_i32 : i32, i32
  }
  func.func @transform_1(%arg0: i32) -> (i32, i32, i32) {
    %c0_i32 = arith.constant 0 : i32
    %c0_i32_0 = arith.constant 0 : i32
    %c0_i32_1 = arith.constant 0 : i32
    %c0_i32_2 = arith.constant 0 : i32
    return %c0_i32, %c0_i32_0, %c0_i32_1 : i32, i32, i32
  }
  func.func @transform_2(%arg0: i32) -> (i32, i32) {
    %c0_i32 = arith.constant 0 : i32
    %c0_i32_0 = arith.constant 0 : i32
    return %arg0, %c0_i32 : i32, i32
  }
}

</mosaic_0001>

<bundles_post_ra>
// kernel: tpu_custom_call.1
= control target key start
LH: loop header
LB: loop body
LE: loop exit
PB: predicated region body
PF: predicated region fallthrough
CT: control target
= control target key end

     0   :  { %7 = vsyncpa [#allocation3], 0  ;;  %s496_s0 = inlined_call_operand.hbm [shape: bf16[16,256], index: 0, kind: input, shape index: {}]   ;;  %s497_s1 = inlined_call_operand.hbm [shape: bf16[2,128,128], index: 1, kind: input, shape index: {}]   ;;  %s498_s2 = inlined_call_operand.hbm [shape: f32[16,256], index: 2, kind: output, shape index: {}]  }
   0x1   :  { %8 = vsyncpa [#allocation6], 0 }
   0x2   :  { %9 = vsyncpa [#allocation4], 0  ;;  %s461_s9 = smov [#allocation2]  }
   0x3   :  { %s15_s10 = sshll.u32 %s461_s9, 4  ;;  %s16_s10 = int_to_ptr.vmem [resolvable:$true] %s15_s10 }
   0x4   :  { %s403_s11 = scalar_lea.vmem %s16_s10, 256  ;;  %p408_p1 = scmp.lt.s32.totalorder %s16_s10, %s16_s10 }
   0x5   :  { %p404_p0 = scmp.ne.s32.totalorder %s16_s10, %s403_s11  ;;  %p409_p2 = scmp.lt.s32.totalorder %s403_s11, %s403_s11 }
   0x7   :  { %p410_p3 = por %p409_p2, %p408_p1 }
   0x9   :  { %p411_p4 = pnand %p410_p3, %p404_p0 }
   0xb   :  { %414 = shalt.err (!%p411_p4)
}
   0xc   :  { %s462_s12 = smov 128   ;;  %s463_s13 = smov 8  }
   0xd   :  { %21 = dma.hbm_to_vmem [thread:$0]  %s496_s0, 256, %s16_s10, [#allocation3], %s462_s12, %s462_s12, %s463_s13  }
   0xe   :  { %s464_s16 = smov [#allocation5]  }
   0xf   :  { %s27_s17 = sshll.u32 %s464_s16, 4  ;;  %s28_s17 = int_to_ptr.vmem [resolvable:$true] %s27_s17 }
  0x10   :  { %s423_s18 = scalar_lea.vmem %s28_s17, 2048  ;;  %p428_p6 = scmp.lt.s32.totalorder %s28_s17, %s28_s17 }
  0x11   :  { %p424_p5 = scmp.ne.s32.totalorder %s28_s17, %s423_s18  ;;  %p429_p7 = scmp.lt.s32.totalorder %s423_s18, %s423_s18 }
  0x13   :  { %p430_p8 = por %p429_p7, %p428_p6 }
  0x15   :  { %p431_p9 = pnand %p430_p8, %p424_p5 }
  0x17   :  { %434 = shalt.err (!%p431_p9)
}
  0x18   :  { %s465_s19 = smov 64   ;;  %s466_s20 = smov 4  }
  0x19   :  { %33 = dma.hbm_to_vmem [thread:$0]  %s497_s1, 2048, %s28_s17, [#allocation6], %s465_s19, %s465_s19, %s466_s20  }
  0x1a   :  { %455 = dma.done.wait [#allocation3], 256  }
  0x1b   :  { %456 = vsyncadd [#allocation3], 4294967040 }
  0x1c   :  { %457 = dma.done.wait [#allocation6], 2048  }
  0x1d   :  { %458 = vsyncadd [#allocation6], 4294965248  ;;  %v467_v0 = vmov 0.0   ;;  %vm468_vm0 = vmmov 0   ;;  %v377_v1 = vld [vmem:[#allocation5 + $0x38] sm:$0xff]   ;;  %v379_v3 = vld [vmem:[#allocation5 + $0x30] sm:$0xff]  }
  0x1e   :  { %326 = vmatprep.subr.bf16.mxu0 %v467_v0  ;;  %346 = vmatprep.subr.bf16.mxu1 %v467_v0  ;;  %v378_v2 = vld [vmem:[#allocation5 + $0x78] sm:$0xff]   ;;  %v380_v4 = vld [vmem:[#allocation5 + $0x70] sm:$0xff]   ;;  %v381_v5 = vld [vmem:[#allocation5 + $0x28] sm:$0xff]   ;;  %s469_s0 = smov [#allocation7]  }
  0x1f   :  { %342 = vmatprep.mubr.msk.bf16.mxu0 %vm468_vm0, %v467_v0  ;;  %362 = vmatprep.mubr.msk.bf16.mxu1 %vm468_vm0, %v467_v0  ;;  %v382_v6 = vld [vmem:[#allocation5 + $0x68] sm:$0xff]   ;;  %v383_v7 = vld [vmem:[#allocation5 + $0x20] sm:$0xff]   ;;  %v385_v9 = vld [vmem:[#allocation5 + $0x18] sm:$0xff]   ;;  %s277_s1 = sshll.u32 %s469_s0, 4  ;;  %s278_s1 = int_to_ptr.vmem [resolvable:$true] %s277_s1 }
  0x20   :  { %327 = vmatpush3.bf16.xpose.msra.mxu0 %v377_v1  ;;  %347 = vmatpush3.bf16.xpose.msra.mxu1 %v378_v2  ;;  %v384_v8 = vld [vmem:[#allocation5 + $0x60] sm:$0xff]   ;;  %v386_v10 = vld [vmem:[#allocation5 + $0x58] sm:$0xff]   ;;  %v387_v11 = vld [vmem:[#allocation5 + $0x10] sm:$0xff]   ;;  %s435_s23 = scalar_lea.vmem %s278_s1, 512  ;;  %p440_p11 = scmp.lt.s32.totalorder %s278_s1, %s278_s1 }
  0x21   :  { %328 = vmatprep.subr.bf16.mxu0 %v467_v0  ;;  %348 = vmatprep.subr.bf16.mxu1 %v467_v0  ;;  %v388_v12 = vld [vmem:[#allocation5 + $0x50] sm:$0xff]   ;;  %v389_v13 = vld [vmem:[#allocation5 + $0x8] sm:$0xff]   ;;  %v391_v15 = vld [vmem:[#allocation5] sm:$0xff]   ;;  %p436_p10 = scmp.ne.s32.totalorder %s278_s1, %s435_s23  ;;  %p441_p12 = scmp.lt.s32.totalorder %s435_s23, %s435_s23 }
  0x22   :  { %v390_v14 = vld [vmem:[#allocation5 + $0x48] sm:$0xff]   ;;  %v392_v16 = vld [vmem:[#allocation5 + $0x40] sm:$0xff]   ;;  %v393_v17 = vld [vmem:[#allocation2] ss:$8 sps:$4 sm:$0xff]  }
  0x23   :  { %v394_v18 = vld [vmem:[#allocation2 + $0x4] ss:$8 sps:$4 sm:$0xff]   ;;  %p442_p13 = por %p441_p12, %p440_p11 }
  0x25   :  { %p443_p0 = pnand %p442_p13, %p436_p10 }
  0x28   :  { %329 = vmatpush3.bf16.xpose.msra.mxu0 %v379_v3  ;;  %349 = vmatpush3.bf16.xpose.msra.mxu1 %v380_v4 }
  0x29   :  { %330 = vmatprep.subr.bf16.mxu0 %v467_v0  ;;  %350 = vmatprep.subr.bf16.mxu1 %v467_v0 }
  0x30   :  { %331 = vmatpush3.bf16.xpose.msra.mxu0 %v381_v5  ;;  %351 = vmatpush3.bf16.xpose.msra.mxu1 %v382_v6 }
  0x31   :  { %332 = vmatprep.subr.bf16.mxu0 %v467_v0  ;;  %352 = vmatprep.subr.bf16.mxu1 %v467_v0 }
  0x38   :  { %333 = vmatpush3.bf16.xpose.msra.mxu0 %v383_v7  ;;  %353 = vmatpush3.bf16.xpose.msra.mxu1 %v384_v8 }
  0x39   :  { %334 = vmatprep.subr.bf16.mxu0 %v467_v0  ;;  %354 = vmatprep.subr.bf16.mxu1 %v467_v0 }
  0x40   :  { %335 = vmatpush3.bf16.xpose.msra.mxu0 %v385_v9  ;;  %355 = vmatpush3.bf16.xpose.msra.mxu1 %v386_v10 }
  0x41   :  { %336 = vmatprep.subr.bf16.mxu0 %v467_v0  ;;  %356 = vmatprep.subr.bf16.mxu1 %v467_v0 }
  0x48   :  { %337 = vmatpush3.bf16.xpose.msra.mxu0 %v387_v11  ;;  %357 = vmatpush3.bf16.xpose.msra.mxu1 %v388_v12 }
  0x49   :  { %338 = vmatprep.subr.bf16.mxu0 %v467_v0  ;;  %358 = vmatprep.subr.bf16.mxu1 %v467_v0 }
  0x50   :  { %339 = vmatpush3.bf16.xpose.msra.mxu0 %v389_v13  ;;  %359 = vmatpush3.bf16.xpose.msra.mxu1 %v390_v14 }
  0x51   :  { %340 = vmatprep.subr.bf16.mxu0 %v467_v0  ;;  %360 = vmatprep.subr.bf16.mxu1 %v467_v0 }
  0x58   :  { %341 = vmatpush3.bf16.xpose.msra.mxu0 %v391_v15  ;;  %361 = vmatpush3.bf16.xpose.msra.mxu1 %v392_v16 }
  0x5f   :  { %343 = vmatmul.mubr.bf16.vlgmr.msra.gmra.mxu0 %v393_v17  ;;  %363 = vmatmul.mubr.bf16.vlgmr.msra.gmra.mxu1 %v394_v18 }
 0x11f   :  { %v147_v19 = vpop.f32.mrf.mxu0  ;;  %v261_v20 = vpop.f32.mrf.mxu1 }
 0x120   :  { %268 = vst [vmem:[#allocation7] sm:$0xff] %v147_v19  ;;  %269 = vst [vmem:[#allocation7 + $0x8] sm:$0xff] %v261_v20 }
 0x121   :  { %v344_v21 = vpop.f32.mrf.mxu0  ;;  %v364_v22 = vpop.f32.mrf.mxu1 }
 0x123   :  { %v150_v23 = vpop.f32.mrf.mxu0  ;;  %v264_v24 = vpop.f32.mrf.mxu1 }
 0x124   :  { %270 = vst [vmem:[#allocation7 + $0x10] sm:$0xff] %v150_v23  ;;  %271 = vst [vmem:[#allocation7 + $0x18] sm:$0xff] %v264_v24 }
 0x125   :  { %v345_v25 = vpop.f32.mrf.mxu0  ;;  %v365_v26 = vpop.f32.mrf.mxu1 }
 0x126   :  { %446 = shalt.err (!%p443_p0)
}
 0x127   :  { %s470_s24 = smov 256   ;;  %s471_s25 = smov 16  }
 0x128   :  { %283 = dma.vmem_to_hbm [thread:$0]  %s278_s1, 512, %s498_s2, [#allocation4], %s470_s24, %s470_s24, %s471_s25  }
 0x129   :  { %459 = dma.done.wait [#allocation4], 512  }
 0x12a   :  { %460 = vsyncadd [#allocation4], 4294966784 }
 0x12b   :  { %287 = vsyncpa [#allocation3], 1 }
 0x12c   :  { %288 = vsyncpa [#allocation6], 1 }
 0x12d   :  { %289 = vsyncpa [#allocation4], 1 }

</bundles_post_ra>
